<compile_context>
chip_gen: v7x
topology: tpu7x:2x2x1
jax: 0.10.0
libtpu: 0.0.40
codegen_flags: <defaults>
</compile_context>

<pallas_src>
import functools

import jax
import jax.numpy as jnp
from jax.experimental import pallas as pl
from jax.experimental.pallas import tpu as pltpu

_TILE = 512       # square tile edge for the tiled path (multiple of 8 and 128)
_SMALL_N = 1024   # single full-array-tile fast path threshold


def _scaled_rbf_kernel(jitter, params_ref, x1_ref, x2_ref, o_ref):
    # params_ref: (2,) f32 in SMEM -> [outputscale, -0.5 / lengthscale**2]
    # x1_ref: (TM, 1) f32 block of the column vector
    # x2_ref: (1, TN) f32 block of the row vector
    # o_ref : (TM, TN) f32 output block
    i = pl.program_id(0)
    j = pl.program_id(1)

    scale = params_ref[0]
    c = params_ref[1]

    d = x1_ref[...] - x2_ref[...]          # broadcast -> (TM, TN)
    k = scale * jnp.exp(c * (d * d))       # scaled RBF block

    @pl.when(i != j)
    def _():
        o_ref[...] = k

    # Square tiles (TM == TN) => the global diagonal only crosses i == j tiles,
    # where it sits exactly at local row == local col.
    @pl.when(i == j)
    def _():
        tm, tn = o_ref.shape
        rows = jax.lax.broadcasted_iota(jnp.int32, (tm, tn), 0)
        cols = jax.lax.broadcasted_iota(jnp.int32, (tm, tn), 1)
        o_ref[...] = jnp.where(rows == cols, k + jnp.float32(jitter), k)


def scaled_rbf_kernel(x1, x2=None, *, raw_outputscale=0.0, raw_lengthscale=0.0,
                      jitter=1e-3):
    """Equivalent of ScaledRBFKernel.forward(x1, x2)."""
    if x2 is None:
        x2 = x1
    x1 = jnp.asarray(x1, jnp.float32).reshape(-1)
    x2 = jnp.asarray(x2, jnp.float32).reshape(-1)
    n = x1.shape[0]
    m = x2.shape[0]
    # jitter * eye(n) is added to the (n, m) kernel => module requires n == m.
    assert n == m, "ScaledRBFKernel adds jitter*eye(N); x1 and x2 must match"

    # Parameter glue (not the hot path): softplus + precomputed multiplier.
    outputscale = jax.nn.softplus(jnp.asarray(raw_outputscale, jnp.float32))
    lengthscale = jax.nn.softplus(jnp.asarray(raw_lengthscale, jnp.float32))
    c = jnp.float32(-0.5) / (lengthscale * lengthscale)
    params = jnp.stack([outputscale.reshape(()), c.reshape(())])   # (2,) f32

    # Tile choice: one full-array tile for small N (no pipeline step overhead),
    # otherwise square 512x512 tiles (lane-dense unmasked stores, bounded VMEM
    # independent of N, row/col grid parallel for megacore).
    if n <= _SMALL_N:
        tm = tn = n
    else:
        tm = tn = _TILE
    grid = (pl.cdiv(n, tm), pl.cdiv(n, tn))

    kernel = functools.partial(_scaled_rbf_kernel, float(jitter))

    out = pl.pallas_call(
        kernel,
        out_shape=jax.ShapeDtypeStruct((n, n), jnp.float32),
        grid=grid,
        in_specs=[
            pl.BlockSpec(memory_space=pltpu.MemorySpace.SMEM),   # (scale, c)
            pl.BlockSpec((tm, 1), lambda i, j: (i, 0)),          # x1 column
            pl.BlockSpec((1, tn), lambda i, j: (0, j)),          # x2 row
        ],
        out_specs=pl.BlockSpec((tm, tn), lambda i, j: (i, j)),
        compiler_params=pltpu.CompilerParams(
            dimension_semantics=("parallel", "parallel")),
    )(params, x1.reshape(n, 1), x2.reshape(1, n))
    return out


def _reference(x1, x2, raw_outputscale, raw_lengthscale, jitter):
    os_ = jax.nn.softplus(jnp.asarray(raw_outputscale, jnp.float32))
    ls = jax.nn.softplus(jnp.asarray(raw_lengthscale, jnp.float32))
    k = jnp.exp(-0.5 * ((x1[:, None] - x2[None, :]) / ls) ** 2)
    return os_ * k + jitter * jnp.eye(x1.shape[0], dtype=jnp.float32)


if __name__ == "__main__":
    key = jax.random.PRNGKey(0)

    # Small case (single-tile fast path), 1-D input like the PyTorch module.
    n = 128
    x1 = jax.random.normal(key, (n,), jnp.float32)
    out = jax.block_until_ready(scaled_rbf_kernel(x1))
    ref = _reference(x1, x1, 0.0, 0.0, 1e-3)
    assert out.shape == (n, n) and out.dtype == jnp.float32
    assert jnp.allclose(out, ref, atol=1e-5), "mismatch vs reference (n=128)"

    # Tiled path check (512x512 tiles incl. partial edge blocks + diagonal gate).
    n2 = 1280
    xa = jax.random.normal(jax.random.PRNGKey(1), (n2,), jnp.float32)
    xb = jax.random.normal(jax.random.PRNGKey(2), (n2,), jnp.float32)
    out2 = jax.block_until_ready(
        scaled_rbf_kernel(xa, xb, raw_outputscale=0.3, raw_lengthscale=-0.2,
                          jitter=1e-3))
    ref2 = _reference(xa, xb, 0.3, -0.2, 1e-3)
    assert jnp.allclose(out2, ref2, atol=1e-5), "mismatch vs reference (n=1280)"

    print("KERNEL_OK")
</pallas_src>

<mosaic_0001>
module attributes {stable_mosaic.version = 11 : i64} {
  func.func @_scaled_rbf_kernel(%arg0: i32, %arg1: i32, %arg2: memref<2xf32, #tpu.memory_space<smem>>, %arg3: memref<128x1xf32, #tpu.memory_space<vmem>>, %arg4: memref<1x128xf32, #tpu.memory_space<vmem>>, %arg5: memref<128x128xf32, #tpu.memory_space<vmem>>) attributes {dimension_semantics = [#tpu.dimension_semantics<parallel>, #tpu.dimension_semantics<parallel>], iteration_bounds = array<i64: 1, 1>, scalar_prefetch = 0 : i64, scratch_operands = 0 : i64, tpu.core_type = #tpu.core_type<tc>, window_params = [{transform_indices = @transform_0, window_bounds = array<i64: 2>}, {transform_indices = @transform_1, window_bounds = array<i64: 128, 1>}, {transform_indices = @transform_2, window_bounds = array<i64: 1, 128>}, {transform_indices = @transform_3, window_bounds = array<i64: 128, 128>}]} {
    %c0 = arith.constant 0 : index
    %0 = memref.load %arg2[%c0] : memref<2xf32, #tpu.memory_space<smem>>
    %c1 = arith.constant 1 : index
    %1 = memref.load %arg2[%c1] : memref<2xf32, #tpu.memory_space<smem>>
    %c0_0 = arith.constant 0 : index
    %c0_1 = arith.constant 0 : index
    %2 = vector.load %arg3[%c0_0, %c0_1] : memref<128x1xf32, #tpu.memory_space<vmem>>, vector<128x1xf32>
    %c0_2 = arith.constant 0 : index
    %c0_3 = arith.constant 0 : index
    %3 = vector.load %arg4[%c0_2, %c0_3] : memref<1x128xf32, #tpu.memory_space<vmem>>, vector<1x128xf32>
    %4 = vector.broadcast %2 : vector<128x1xf32> to vector<128x128xf32>
    %5 = vector.broadcast %3 : vector<1x128xf32> to vector<128x128xf32>
    %6 = arith.subf %4, %5 : vector<128x128xf32>
    %7 = arith.mulf %6, %6 : vector<128x128xf32>
    %8 = vector.broadcast %1 : f32 to vector<128x128xf32>
    %9 = arith.mulf %8, %7 : vector<128x128xf32>
    %10 = math.exp %9 : vector<128x128xf32>
    %11 = vector.broadcast %0 : f32 to vector<128x128xf32>
    %12 = arith.mulf %11, %10 : vector<128x128xf32>
    %13 = arith.cmpi ne, %arg0, %arg1 : i32
    %14 = arith.extui %13 : i1 to i32
    %c0_i32 = arith.constant 0 : i32
    %15 = arith.cmpi ne, %14, %c0_i32 : i32
    scf.if %15 {
      %c0_5 = arith.constant 0 : index
      %c0_6 = arith.constant 0 : index
      %19 = vector.load %arg5[%c0_5, %c0_6] : memref<128x128xf32, #tpu.memory_space<vmem>>, vector<128x128xf32>
      tpu.vector_store %arg5[%c0_5, %c0_6], %12 {strides = array<i32>} : memref<128x128xf32, #tpu.memory_space<vmem>>, vector<128x128xf32>,
    } else {
    }
    %16 = arith.cmpi eq, %arg0, %arg1 : i32
    %17 = arith.extui %16 : i1 to i32
    %c0_i32_4 = arith.constant 0 : i32
    %18 = arith.cmpi ne, %17, %c0_i32_4 : i32
    scf.if %18 {
      %19 = tpu.iota {dimensions = array<i32: 0>} : vector<128x128xi32>
      %20 = tpu.iota {dimensions = array<i32: 1>} : vector<128x128xi32>
      %21 = arith.cmpi eq, %19, %20 : vector<128x128xi32>
      %cst = arith.constant 1.000000e-03 : f32
      %22 = vector.broadcast %cst : f32 to vector<128x128xf32>
      %23 = arith.addf %12, %22 : vector<128x128xf32>
      %24 = arith.select %21, %23, %12 : vector<128x128xi1>, vector<128x128xf32>
      %c0_5 = arith.constant 0 : index
      %c0_6 = arith.constant 0 : index
      %25 = vector.load %arg5[%c0_5, %c0_6] : memref<128x128xf32, #tpu.memory_space<vmem>>, vector<128x128xf32>
      tpu.vector_store %arg5[%c0_5, %c0_6], %24 {strides = array<i32>} : memref<128x128xf32, #tpu.memory_space<vmem>>, vector<128x128xf32>,
    } else {
    }
    return
  }
  func.func @transform_0(%arg0: i32, %arg1: i32) -> i32 {
    %c0_i32 = arith.constant 0 : i32
    %c0_i32_0 = arith.constant 0 : i32
    return %c0_i32 : i32
  }
  func.func @transform_1(%arg0: i32, %arg1: i32) -> (i32, i32) {
    %c0_i32 = arith.constant 0 : i32
    %c0_i32_0 = arith.constant 0 : i32
    return %arg0, %c0_i32 : i32, i32
  }
  func.func @transform_2(%arg0: i32, %arg1: i32) -> (i32, i32) {
    %c0_i32 = arith.constant 0 : i32
    %c0_i32_0 = arith.constant 0 : i32
    return %c0_i32, %arg1 : i32, i32
  }
  func.func @transform_3(%arg0: i32, %arg1: i32) -> (i32, i32) {
    %c0_i32 = arith.constant 0 : i32
    return %arg0, %arg1 : i32, i32
  }
}

</mosaic_0001>

<bundles_post_ra>
// kernel: tpu_custom_call.1
= control target key start
LH: loop header
LB: loop body
LE: loop exit
PB: predicated region body
PF: predicated region fallthrough
CT: control target
= control target key end

     0   :  { %8 = vsyncpa [#allocation4], 0  ;;  %s662_s0 = inlined_call_operand.vmem [shape: f32[2], index: 0, kind: input, shape index: {}]   ;;  %s663_s1 = inlined_call_operand.vmem [shape: f32[128,1], index: 1, kind: input, shape index: {}]   ;;  %s664_s2 = inlined_call_operand.vmem [shape: f32[1,128], index: 2, kind: input, shape index: {}]   ;;  %s665_s3 = inlined_call_operand.hbm [shape: f32[128,128], index: 3, kind: output, shape index: {}]  }
   0x1   :  { %9 = vsyncpa [#allocation3], 0  ;;  %s16_s14 = sshll.u32 %s662_s0, 4  ;;  %s17_s14 = int_to_ptr.vmem [resolvable:$true] %s16_s14 }
   0x2   :  { %s396_s15 = scalar_lea.vmem %s17_s14, 16  ;;  %p401_p1 = scmp.lt.s32.totalorder %s17_s14, %s17_s14 }
   0x3   :  { %p397_p0 = scmp.ne.s32.totalorder %s17_s14, %s396_s15  ;;  %p402_p2 = scmp.lt.s32.totalorder %s396_s15, %s396_s15 }
   0x5   :  { %p403_p3 = por %p402_p2, %p401_p1 }
   0x7   :  { %p404_p4 = pnand %p403_p3, %p397_p0 }
   0x9   :  { %407 = shalt.err (!%p404_p4)
}
   0xa   :  { %s434_s16 = smov [#allocation2]  }
   0xb   :  { %19 = dma.vmem_to_smem %s17_s14, 16, %s434_s16, [#allocation4]  }
   0xc   :  { %430 = dma.done.wait [#allocation4], 16  }
   0xd   :  { %431 = vsyncadd [#allocation4], 4294967280 }
   0xe   :  { %27 = sfence }
   0xf   :  { %v32_v0 = vld [vmem:[%s663_s1 + $0x10] sm:$0xff]  ;;  %v30_v1 = vld [vmem:[%s663_s1] sm:$0xff]  ;;  %v435_v2 = vmov 0   ;;  %v33_v3 = vld [vmem:[%s663_s1 + $0x18] sm:$0xff]  ;;  %s355_s0 = sld [smem:[#allocation2 + $0x1]]  ;;  %v255_v22 = vlaneseq }
  0x10   :  { %363 = vset.pattern.permute.xlu1 %v435_v2  ;;  %362 = vset.pattern.permute.xlu0 %v435_v2  ;;  %v31_v4 = vld [vmem:[%s663_s1 + $0x8] sm:$0xff]  ;;  %v34_v6 = vld [vmem:[%s663_s1 + $0x20] sm:$0xff]  ;;  %v37_v7 = vld [vmem:[%s663_s1 + $0x38] sm:$0xff] }
  0x11   :  { %59 = vperm.xlu1 %363, %v32_v0   ;;  %49 = vperm.xlu0 %362, %v30_v1   ;;  %v35_v5 = vld [vmem:[%s663_s1 + $0x28] sm:$0xff]  ;;  %v36_v8 = vld [vmem:[%s663_s1 + $0x30] sm:$0xff]  ;;  %v38_v10 = vld [vmem:[%s663_s1 + $0x40] sm:$0xff]  ;;  %v523_v32 = vshrl.u32 %v255_v22, 7  ;;  %v531_v43 = vand.u32 127, %v255_v22 }
  0x12   :  { %v39_v9 = vld [vmem:[%s663_s1 + $0x48] sm:$0xff]  ;;  %v41_v11 = vld [vmem:[%s663_s1 + $0x58] sm:$0xff]  ;;  %v40_v12 = vld [vmem:[%s663_s1 + $0x50] sm:$0xff] }
  0x13   :  { %v43_v13 = vld [vmem:[%s663_s1 + $0x68] sm:$0xff]  ;;  %v42_v14 = vld [vmem:[%s663_s1 + $0x60] sm:$0xff]  ;;  %v45_v15 = vld [vmem:[%s663_s1 + $0x78] sm:$0xff]  ;;  %v529_v42 = vadd.s32 16, %v523_v32  ;;  %v541_v55 = vadd.s32 24, %v523_v32  ;;  %v546_v60 = vadd.s32 8, %v523_v32  ;;  %vm274_vm1 = vcmp.eq.s32.totalorder %v523_v32, %v531_v43 }
  0x14   :  { %v44_v16 = vld [vmem:[%s663_s1 + $0x70] sm:$0xff]  ;;  %v513_v17 = vld [vmem:[%s664_s2] ss:$0 sm:$0xff]  ;;  %s28_s1 = sld [smem:[#allocation2]]  ;;  %v549_v61 = vadd.s32 40, %v523_v32  ;;  %s436_s2 = smov [#allocation5]  }
  0x15   :  { %64 = vperm.xlu1 %363, %v33_v3   ;;  %54 = vperm.xlu0 %362, %v31_v4   ;;  %v517_v23 = vstv %s355_s0  ;;  %vm276_vm0 = vcmp.eq.s32.totalorder %v529_v42, %v531_v43  ;;  %v557_v4 = vadd.s32 32, %v523_v32  ;;  %vm277_vm2 = vcmp.eq.s32.totalorder %v541_v55, %v531_v43  ;;  %s343_s23 = sshll.u32 %s436_s2, 4  ;;  %s344_s23 = int_to_ptr.vmem [resolvable:$true] %s343_s23 }
  0x16   :  { %vm275_vm3 = vcmp.eq.s32.totalorder %v546_v60, %v531_v43  ;;  %vm279_vm4 = vcmp.eq.s32.totalorder %v549_v61, %v531_v43  ;;  %s408_s24 = scalar_lea.vmem %s344_s23, 2048  ;;  %p413_p6 = scmp.lt.s32.totalorder %s344_s23, %s344_s23 }
  0x17   :  { %vm278_vm5 = vcmp.eq.s32.totalorder %v557_v4, %v531_v43  ;;  %p409_p5 = scmp.ne.s32.totalorder %s344_s23, %s408_s24  ;;  %p414_p7 = scmp.lt.s32.totalorder %s408_s24, %s408_s24 }
  0x19   :  { %74 = vperm.xlu1 %363, %v35_v5   ;;  %69 = vperm.xlu0 %362, %v34_v6   ;;  %p415_p8 = por %p414_p7, %p413_p6 }
  0x1a   :  { %v543_v59 = vstv %s28_s1 }
  0x1b   :  { %p416_p9 = pnand %p415_p8, %p409_p5 }
  0x1d   :  { %84 = vperm.xlu1 %363, %v37_v7   ;;  %79 = vperm.xlu0 %362, %v36_v8  }
  0x21   :  { %94 = vperm.xlu1 %363, %v39_v9   ;;  %89 = vperm.xlu0 %362, %v38_v10  }
  0x25   :  { %104 = vperm.xlu1 %363, %v41_v11   ;;  %99 = vperm.xlu0 %362, %v40_v12   ;;  %v566_v12 = vadd.s32 56, %v523_v32 }
  0x27   :  { %vm281_vm6 = vcmp.eq.s32.totalorder %v566_v12, %v531_v43  ;;  %v266_v12 = vadd.s32 80, %v523_v32 }
  0x29   :  { %114 = vperm.xlu1 %363, %v43_v13   ;;  %109 = vperm.xlu0 %362, %v42_v14   ;;  %vm284_vm11 = vcmp.eq.s32.totalorder %v266_v12, %v531_v43 }
  0x2d   :  { %124 = vperm.xlu1 %363, %v45_v15   ;;  %119 = vperm.xlu0 %362, %v44_v16  }
  0x90   :  { %v60_v18 = vpop.permute.xlu1 %59  ;;  %v50_v19 = vpop.permute.xlu0 %49 }
  0x91   :  { %v135_v20 = vsub.f32 %v60_v18, %v513_v17  ;;  %v133_v21 = vsub.f32 %v50_v19, %v513_v17 }
  0x93   :  { %v151_v24 = vmul.f32 %v135_v20, %v135_v20  ;;  %v149_v25 = vmul.f32 %v133_v21, %v133_v21 }
  0x94   :  { %v65_v26 = vpop.permute.xlu1 %64  ;;  %v55_v27 = vpop.permute.xlu0 %54 }
  0x95   :  { %v168_v28 = vmul.f32 %v517_v23, %v151_v24  ;;  %v166_v29 = vmul.f32 %v517_v23, %v149_v25  ;;  %v136_v30 = vsub.f32 %v65_v26, %v513_v17  ;;  %v134_v31 = vsub.f32 %v55_v27, %v513_v17 }
  0x96   :  { %v578_v26 = vadd.s32 48, %v523_v32 }
  0x97   :  { %v186_v33 = vmul.f32 1.442695, %v168_v28  ;;  %v182_v34 = vmul.f32 1.442695, %v166_v29  ;;  %v152_v35 = vmul.f32 %v136_v30, %v136_v30  ;;  %v150_v36 = vmul.f32 %v134_v31, %v134_v31 }
  0x98   :  { %v75_v37 = vpop.permute.xlu1 %74  ;;  %v70_v38 = vpop.permute.xlu0 %69  ;;  %vm280_vm7 = vcmp.eq.s32.totalorder %v578_v26, %v531_v43 }
  0x99   :  { %364 = vpow2.f32 %v186_v33  ;;  %v169_v39 = vmul.f32 %v517_v23, %v152_v35  ;;  %v167_v40 = vmul.f32 %v517_v23, %v150_v36  ;;  %v138_v41 = vsub.f32 %v75_v37, %v513_v17 }
  0x9a   :  { %366 = vpow2.f32 %v182_v34  ;;  %v137_v44 = vsub.f32 %v70_v38, %v513_v17 }
  0x9b   :  { %v188_v45 = vmul.f32 1.442695, %v169_v39  ;;  %v184_v46 = vmul.f32 1.442695, %v167_v40  ;;  %v154_v47 = vmul.f32 %v138_v41, %v138_v41 }
  0x9c   :  { %v153_v48 = vmul.f32 %v137_v44, %v137_v44  ;;  %v85_v49 = vpop.permute.xlu1 %84  ;;  %v80_v50 = vpop.permute.xlu0 %79 }
  0x9d   :  { %368 = vpow2.f32 %v188_v45  ;;  %v171_v51 = vmul.f32 %v517_v23, %v154_v47  ;;  %v140_v52 = vsub.f32 %v85_v49, %v513_v17  ;;  %v139_v53 = vsub.f32 %v80_v50, %v513_v17 }
  0x9e   :  { %370 = vpow2.f32 %v184_v46  ;;  %v170_v54 = vmul.f32 %v517_v23, %v153_v48 }
  0x9f   :  { %v192_v56 = vmul.f32 1.442695, %v171_v51  ;;  %v156_v57 = vmul.f32 %v140_v52, %v140_v52  ;;  %v155_v58 = vmul.f32 %v139_v53, %v139_v53 }
  0xa0   :  { %v190_v62 = vmul.f32 1.442695, %v170_v54  ;;  %v95_v63 = vpop.permute.xlu1 %94  ;;  %v90_v0 = vpop.permute.xlu0 %89 }
  0xa1   :  { %372 = vpow2.f32 %v192_v56  ;;  %v173_v1 = vmul.f32 %v517_v23, %v156_v57  ;;  %v172_v2 = vmul.f32 %v517_v23, %v155_v58  ;;  %v142_v3 = vsub.f32 %v95_v63, %v513_v17 }
  0xa2   :  { %374 = vpow2.f32 %v190_v62  ;;  %v141_v5 = vsub.f32 %v90_v0, %v513_v17 }
  0xa3   :  { %v365_v6 = vpop.eup %364  ;;  %v196_v7 = vmul.f32 1.442695, %v173_v1  ;;  %v194_v8 = vmul.f32 1.442695, %v172_v2  ;;  %v158_v9 = vmul.f32 %v142_v3, %v142_v3  ;;  %v265_v2 = vadd.s32 72, %v523_v32 }
  0xa4   :  { %v367_v10 = vpop.eup %366  ;;  %v217_v11 = vmul.f32 %v365_v6, %v543_v59  ;;  %v157_v13 = vmul.f32 %v141_v5, %v141_v5  ;;  %v105_v14 = vpop.permute.xlu1 %104 }
  0xa5   :  { %v100_v15 = vpop.permute.xlu0 %99  ;;  %v215_v16 = vmul.f32 %v367_v10, %v543_v59  ;;  %376 = vpow2.f32 %v196_v7  ;;  %v175_v18 = vmul.f32 %v517_v23, %v158_v9  ;;  %v144_v19 = vsub.f32 %v105_v14, %v513_v17 }
  0xa6   :  { %v292_v20 = vadd.f32 0.001, %v217_v11  ;;  %378 = vpow2.f32 %v194_v8  ;;  %v174_v21 = vmul.f32 %v517_v23, %v157_v13  ;;  %v143_v22 = vsub.f32 %v100_v15, %v513_v17 }
  0xa7   :  { %v369_v24 = vpop.eup %368  ;;  %v290_v25 = vadd.f32 0.001, %v215_v16  ;;  %v200_v27 = vmul.f32 1.442695, %v175_v18  ;;  %v160_v28 = vmul.f32 %v144_v19, %v144_v19  ;;  %v264_v15 = vadd.s32 64, %v523_v32 }
  0xa8   :  { %v371_v29 = vpop.eup %370  ;;  %v308_v30 = vsel %vm276_vm0, %v292_v20, %v217_v11  ;;  %v218_v31 = vmul.f32 %v369_v24, %v543_v59  ;;  %v198_v33 = vmul.f32 1.442695, %v174_v21  ;;  %v159_v34 = vmul.f32 %v143_v22, %v143_v22  ;;  %v115_v35 = vpop.permute.xlu1 %114 }
  0xa9   :  { %v110_v36 = vpop.permute.xlu0 %109  ;;  %324 = vst [vmem:[#allocation5 + $0x10] sm:$0xff] %v308_v30  ;;  %v306_v37 = vsel %vm274_vm1, %v290_v25, %v215_v16  ;;  %v216_v38 = vmul.f32 %v371_v29, %v543_v59  ;;  %380 = vpow2.f32 %v200_v27  ;;  %v177_v39 = vmul.f32 %v517_v23, %v160_v28 }
  0xaa   :  { %322 = vst [vmem:[#allocation5] sm:$0xff] %v306_v37  ;;  %v293_v40 = vadd.f32 0.001, %v218_v31  ;;  %382 = vpow2.f32 %v198_v33  ;;  %v176_v41 = vmul.f32 %v517_v23, %v159_v34  ;;  %v146_v42 = vsub.f32 %v115_v35, %v513_v17 }
  0xab   :  { %v373_v44 = vpop.eup %372  ;;  %v291_v45 = vadd.f32 0.001, %v216_v38  ;;  %v204_v46 = vmul.f32 1.442695, %v177_v39  ;;  %v145_v47 = vsub.f32 %v110_v36, %v513_v17  ;;  %vm283_vm8 = vcmp.eq.s32.totalorder %v265_v2, %v531_v43 }
  0xac   :  { %v375_v48 = vpop.eup %374  ;;  %v309_v49 = vsel %vm277_vm2, %v293_v40, %v218_v31  ;;  %v220_v50 = vmul.f32 %v373_v44, %v543_v59  ;;  %v202_v51 = vmul.f32 1.442695, %v176_v41  ;;  %v162_v52 = vmul.f32 %v146_v42, %v146_v42  ;;  %v125_v53 = vpop.permute.xlu1 %124 }
  0xad   :  { %v120_v54 = vpop.permute.xlu0 %119  ;;  %325 = vst [vmem:[#allocation5 + $0x18] sm:$0xff] %v309_v49  ;;  %v307_v56 = vsel %vm275_vm3, %v291_v45, %v216_v38  ;;  %v219_v57 = vmul.f32 %v375_v48, %v543_v59  ;;  %384 = vpow2.f32 %v204_v46  ;;  %v161_v58 = vmul.f32 %v145_v47, %v145_v47 }
  0xae   :  { %323 = vst [vmem:[#allocation5 + $0x8] sm:$0xff] %v307_v56  ;;  %v295_v62 = vadd.f32 0.001, %v220_v50  ;;  %386 = vpow2.f32 %v202_v51  ;;  %v179_v55 = vmul.f32 %v517_v23, %v162_v52  ;;  %v148_v63 = vsub.f32 %v125_v53, %v513_v17 }
  0xaf   :  { %v377_v0 = vpop.eup %376  ;;  %v294_v1 = vadd.f32 0.001, %v219_v57  ;;  %v178_v3 = vmul.f32 %v517_v23, %v161_v58  ;;  %v147_v60 = vsub.f32 %v120_v54, %v513_v17  ;;  %v267_v27 = vadd.s32 88, %v523_v32 }
  0xb0   :  { %v379_v5 = vpop.eup %378  ;;  %v311_v6 = vsel %vm279_vm4, %v295_v62, %v220_v50  ;;  %v222_v7 = vmul.f32 %v377_v0, %v543_v59  ;;  %v208_v8 = vmul.f32 1.442695, %v179_v55  ;;  %v164_v9 = vmul.f32 %v148_v63, %v148_v63 }
  0xb1   :  { %327 = vst [vmem:[#allocation5 + $0x28] sm:$0xff] %v311_v6  ;;  %v310_v10 = vsel %vm278_vm5, %v294_v1, %v219_v57  ;;  %v221_v11 = vmul.f32 %v379_v5, %v543_v59  ;;  %v206_v13 = vmul.f32 1.442695, %v178_v3  ;;  %v163_v14 = vmul.f32 %v147_v60, %v147_v60 }
  0xb2   :  { %326 = vst [vmem:[#allocation5 + $0x20] sm:$0xff] %v310_v10  ;;  %v297_v17 = vadd.f32 0.001, %v222_v7  ;;  %388 = vpow2.f32 %v208_v8  ;;  %v181_v61 = vmul.f32 %v517_v23, %v164_v9  ;;  %vm282_vm9 = vcmp.eq.s32.totalorder %v264_v15, %v531_v43 }
  0xb3   :  { %v381_v16 = vpop.eup %380  ;;  %v296_v18 = vadd.f32 0.001, %v221_v11  ;;  %390 = vpow2.f32 %v206_v13  ;;  %v180_v19 = vmul.f32 %v517_v23, %v163_v14  ;;  %vm285_vm10 = vcmp.eq.s32.totalorder %v267_v27, %v531_v43 }
  0xb4   :  { %v383_v20 = vpop.eup %382  ;;  %v313_v4 = vsel %vm281_vm6, %v297_v17, %v222_v7  ;;  %v224_v21 = vmul.f32 %v381_v16, %v543_v59  ;;  %v212_v22 = vmul.f32 1.442695, %v181_v61  ;;  %v269_v37 = vadd.s32 104, %v523_v32 }
  0xb5   :  { %329 = vst [vmem:[#allocation5 + $0x38] sm:$0xff] %v313_v4  ;;  %v312_v24 = vsel %vm280_vm7, %v296_v18, %v221_v11  ;;  %v223_v25 = vmul.f32 %v383_v20, %v543_v59  ;;  %v210_v23 = vmul.f32 1.442695, %v180_v19  ;;  %v268_v39 = vadd.s32 96, %v523_v32 }
  0xb6   :  { %328 = vst [vmem:[#allocation5 + $0x30] sm:$0xff] %v312_v24  ;;  %v299_v28 = vadd.f32 0.001, %v224_v21  ;;  %392 = vpow2.f32 %v212_v22  ;;  %vm287_vm12 = vcmp.eq.s32.totalorder %v269_v37, %v531_v43  ;;  %v271_v47 = vadd.s32 120, %v523_v32 }
  0xb7   :  { %v385_v29 = vpop.eup %384  ;;  %v298_v30 = vadd.f32 0.001, %v223_v25  ;;  %394 = vpow2.f32 %v210_v23  ;;  %vm286_vm13 = vcmp.eq.s32.totalorder %v268_v39, %v531_v43  ;;  %v270_v49 = vadd.s32 112, %v523_v32 }
  0xb8   :  { %v387_v31 = vpop.eup %386  ;;  %v315_v26 = vsel %vm283_vm8, %v299_v28, %v224_v21  ;;  %v226_v33 = vmul.f32 %v385_v29, %v543_v59  ;;  %vm289_vm14 = vcmp.eq.s32.totalorder %v271_v47, %v531_v43 }
  0xb9   :  { %331 = vst [vmem:[#allocation5 + $0x48] sm:$0xff] %v315_v26  ;;  %v314_v34 = vsel %vm282_vm9, %v298_v30, %v223_v25  ;;  %v225_v35 = vmul.f32 %v387_v31, %v543_v59  ;;  %vm288_vm15 = vcmp.eq.s32.totalorder %v270_v49, %v531_v43 }
  0xba   :  { %330 = vst [vmem:[#allocation5 + $0x40] sm:$0xff] %v314_v34  ;;  %v301_v36 = vadd.f32 0.001, %v226_v33 }
  0xbb   :  { %v300_v38 = vadd.f32 0.001, %v225_v35 }
  0xbc   :  { %v389_v40 = vpop.eup %388  ;;  %v317_v41 = vsel %vm285_vm10, %v301_v36, %v226_v33 }
  0xbd   :  { %v391_v42 = vpop.eup %390  ;;  %333 = vst [vmem:[#allocation5 + $0x58] sm:$0xff] %v317_v41  ;;  %v316_v44 = vsel %vm284_vm11, %v300_v38, %v225_v35  ;;  %v228_v45 = vmul.f32 %v389_v40, %v543_v59 }
  0xbe   :  { %332 = vst [vmem:[#allocation5 + $0x50] sm:$0xff] %v316_v44  ;;  %v227_v46 = vmul.f32 %v391_v42, %v543_v59 }
  0xbf   :  { %v303_v48 = vadd.f32 0.001, %v228_v45 }
  0xc0   :  { %v393_v50 = vpop.eup %392  ;;  %v302_v51 = vadd.f32 0.001, %v227_v46 }
  0xc1   :  { %v395_v52 = vpop.eup %394  ;;  %v319_v53 = vsel %vm287_vm12, %v303_v48, %v228_v45  ;;  %v230_v54 = vmul.f32 %v393_v50, %v543_v59 }
  0xc2   :  { %335 = vst [vmem:[#allocation5 + $0x68] sm:$0xff] %v319_v53  ;;  %v318_v56 = vsel %vm286_vm13, %v302_v51, %v227_v46  ;;  %v229_v57 = vmul.f32 %v395_v52, %v543_v59 }
  0xc3   :  { %334 = vst [vmem:[#allocation5 + $0x60] sm:$0xff] %v318_v56  ;;  %v305_v58 = vadd.f32 0.001, %v230_v54 }
  0xc4   :  { %v304_v62 = vadd.f32 0.001, %v229_v57 }
  0xc5   :  { %v321_v32 = vsel %vm289_vm14, %v305_v58, %v230_v54 }
  0xc6   :  { %337 = vst [vmem:[#allocation5 + $0x78] sm:$0xff] %v321_v32  ;;  %v320_v55 = vsel %vm288_vm15, %v304_v62, %v229_v57 }
  0xc7   :  { %336 = vst [vmem:[#allocation5 + $0x70] sm:$0xff] %v320_v55 }
  0xc8   :  { %419 = shalt.err (!%p416_p9)
}
  0xc9   :  { %s420_s27 = scalar_lea.hbm %s665_s3, 2048 }
  0xca   :  { %p421_p10 = scmp.ne.s32.totalorder %s665_s3, %s420_s27  ;;  %p424_p11 = scmp.lt.u32.totalorder %s420_s27, %s665_s3 }
  0xcc   :  { %p426_p12 = pnand %p424_p11, %p421_p10 }
  0xce   :  { %429 = shalt.err (!%p426_p12)
}
  0xcf   :  { %s437_s5 = smov 128   ;;  %s438_s6 = smov 8  }
  0xd0   :  { %349 = dma.vmem_to_hbm [thread:$0]  %s344_s23, 2048, %s665_s3, [#allocation3], %s437_s5, %s437_s5, %s438_s6  }
  0xd1   :  { %432 = dma.done.wait [#allocation3], 2048  }
  0xd2   :  { %433 = vsyncadd [#allocation3], 4294965248 }
  0xd3   :  { %353 = vsyncpa [#allocation3], 1 }
  0xd4   :  { %354 = vsyncpa [#allocation4], 1 }

</bundles_post_ra>
